<compile_context>
chip_gen: v7x
topology: tpu7x:2x2x1
jax: 0.10.0
libtpu: 0.0.40
codegen_flags: <defaults>
</compile_context>

<pallas_src>
import functools
import math

import jax
import jax.numpy as jnp
from jax.experimental import pallas as pl
from jax.experimental.pallas import tpu as pltpu

SHIFT = 3  # taps: +1 at (3,3), -1 at (3,6)  ->  out[y,x] = in[y,x] - in[y,x+3]


def _conv_d714_kernel(x_ref, o_ref, *, w):
    # x_ref / o_ref: (TILE_R, LANES) with LANES = k * w (k image rows packed
    # along the lane axis).  rolled[.., j] = x[.., (j + SHIFT) mod LANES];
    # lanes whose in-row column is >= w - SHIFT would read past the image row
    # (the conv's zero padding) or leak into the next packed row, so mask them
    # to zero before subtracting.
    x = x_ref[...]
    lanes = x.shape[-1]
    rolled = pltpu.roll(x, shift=lanes - SHIFT, axis=x.ndim - 1)
    col = jax.lax.broadcasted_iota(jnp.int32, x.shape, x.ndim - 1)
    if lanes != w:
        col = col % w                      # column within the original image row
    b = jnp.where(col < (w - SHIFT), rolled, jnp.zeros_like(rolled))
    o_ref[...] = x - b


def conv_d714(x, *, max_tile_bytes=2 * 1024 * 1024, max_tile_rows=2048):
    """Pallas equivalent of Conv_d714.forward for an NCHW input with C == 1."""
    n, c, h, w = x.shape
    assert c == 1, "Conv_d714's fixed weight is (1, 1, 7, 7): input must have C == 1"
    dtype = x.dtype
    rows = n * h
    x2d = x.reshape(rows, w)

    # Lane-dense packing for small / non-128-multiple W: fold k image rows into
    # one block row so the lane width is a multiple of 128 (unmasked stores).
    k = 1
    if w % 128 != 0:
        kk = 128 // math.gcd(w, 128)       # smallest k with (k * w) % 128 == 0
        if rows % kk == 0:
            k = kk
        # else: fall back to lanes == w (full-dim block; stores are masked but
        # the kernel stays correct).
    r2 = rows // k
    lanes = k * w
    x2d = x2d.reshape(r2, lanes)

    # Row tiling: largest block within a ~2 MiB budget (measured knee of the
    # HBM roofline; in+out double buffers stay <= ~8 MiB), rounded to 8
    # sublanes.  A full-extent block is always legal when everything fits.
    itemsize = jnp.dtype(dtype).itemsize
    budget_rows = max(1, max_tile_bytes // (lanes * itemsize))
    if budget_rows >= r2:
        tile_r = r2                        # single block; full-dim block is always legal
    else:
        tile_r = max(8, min(max_tile_rows, (budget_rows // 8) * 8))

    kernel = functools.partial(_conv_d714_kernel, w=w)
    out2d = pl.pallas_call(
        kernel,
        out_shape=jax.ShapeDtypeStruct((r2, lanes), dtype),
        grid=(pl.cdiv(r2, tile_r),),
        in_specs=[pl.BlockSpec((tile_r, lanes), lambda i: (i, 0))],
        out_specs=pl.BlockSpec((tile_r, lanes), lambda i: (i, 0)),
        compiler_params=pltpu.CompilerParams(
            dimension_semantics=("parallel",)),
    )(x2d)

    return out2d.reshape(n, 1, h, w)


def _reference(x):
    # Pure-JAX reference: out[y, x] = in[y, x] - in[y, x + 3] (zero past edge).
    n, c, h, w = x.shape
    x2d = x.reshape(n * h, w)
    shifted = jnp.pad(x2d[:, SHIFT:], ((0, 0), (0, SHIFT)))
    return (x2d - shifted).reshape(n, 1, h, w)


if __name__ == "__main__":
    key = jax.random.PRNGKey(0)

    # Primary case (exercises the lane-packing path: W=16 -> k=8, lanes=128).
    N, C, H, W = 2, 1, 16, 16
    x = jax.random.normal(key, (N, C, H, W), dtype=jnp.float32)
    out = jax.block_until_ready(conv_d714(x))
    ref = _reference(x)
    assert out.shape == (N, 1, H, W)
    assert out.dtype == x.dtype
    assert jnp.allclose(out, ref, atol=1e-6, rtol=1e-6)

    # Secondary case (exercises the already-lane-aligned path: W=128, k=1).
    x2 = jax.random.normal(jax.random.PRNGKey(0), (1, 1, 8, 128), dtype=jnp.float32)
    out2 = jax.block_until_ready(conv_d714(x2))
    assert jnp.allclose(out2, _reference(x2), atol=1e-6, rtol=1e-6)

    print("KERNEL_OK")
</pallas_src>

<mosaic_0001>
module attributes {stable_mosaic.version = 11 : i64} {
  func.func @_conv_d714_kernel(%arg0: i32, %arg1: memref<4x128xf32, #tpu.memory_space<vmem>>, %arg2: memref<4x128xf32, #tpu.memory_space<vmem>>) attributes {dimension_semantics = [#tpu.dimension_semantics<parallel>], iteration_bounds = array<i64: 1>, scalar_prefetch = 0 : i64, scratch_operands = 0 : i64, tpu.core_type = #tpu.core_type<tc>, window_params = [{transform_indices = @transform_0, window_bounds = array<i64: 4, 128>}, {transform_indices = @transform_1, window_bounds = array<i64: 4, 128>}]} {
    %c0 = arith.constant 0 : index
    %c0_0 = arith.constant 0 : index
    %0 = vector.load %arg1[%c0, %c0_0] : memref<4x128xf32, #tpu.memory_space<vmem>>, vector<4x128xf32>
    %c125_i32 = arith.constant 125 : i32
    %1 = tpu.dynamic_rotate %0 by %c125_i32 dim 1 : vector<4x128xf32>, i32 -> vector<4x128xf32>
    %2 = tpu.iota {dimensions = array<i32: 1>} : vector<4x128xi32>
    %c16_i32 = arith.constant 16 : i32
    %c0_i32 = arith.constant 0 : i32
    %3 = arith.cmpi eq, %c16_i32, %c0_i32 : i32
    %c1_i32 = arith.constant 1 : i32
    %4 = arith.select %3, %c1_i32, %c16_i32 : i32
    %5 = vector.broadcast %4 : i32 to vector<4x128xi32>
    %6 = arith.remsi %2, %5 : vector<4x128xi32>
    %c0_i32_1 = arith.constant 0 : i32
    %7 = vector.broadcast %c0_i32_1 : i32 to vector<4x128xi32>
    %8 = arith.cmpi ne, %6, %7 : vector<4x128xi32>
    %c0_i32_2 = arith.constant 0 : i32
    %9 = vector.broadcast %c0_i32_2 : i32 to vector<4x128xi32>
    %10 = arith.cmpi slt, %6, %9 : vector<4x128xi32>
    %c0_i32_3 = arith.constant 0 : i32
    %11 = arith.cmpi slt, %4, %c0_i32_3 : i32
    %12 = vector.broadcast %11 : i1 to vector<4x128xi1>
    %13 = vector.broadcast %12 : vector<4x128xi1> to vector<4x128xi1>
    %14 = arith.xori %10, %13 : vector<4x128xi1>
    %15 = arith.andi %14, %8 : vector<4x128xi1>
    %16 = vector.broadcast %4 : i32 to vector<4x128xi32>
    %17 = arith.addi %6, %16 : vector<4x128xi32>
    %18 = arith.select %15, %17, %6 : vector<4x128xi1>, vector<4x128xi32>
    %c13_i32 = arith.constant 13 : i32
    %19 = vector.broadcast %c13_i32 : i32 to vector<4x128xi32>
    %20 = arith.cmpi slt, %18, %19 : vector<4x128xi32>
    %cst = arith.constant 0.000000e+00 : f32
    %21 = vector.broadcast %cst : f32 to vector<4x128xf32>
    %22 = arith.select %20, %1, %21 : vector<4x128xi1>, vector<4x128xf32>
    %23 = arith.subf %0, %22 : vector<4x128xf32>
    %c0_4 = arith.constant 0 : index
    %c0_5 = arith.constant 0 : index
    %24 = vector.load %arg2[%c0_4, %c0_5] : memref<4x128xf32, #tpu.memory_space<vmem>>, vector<4x128xf32>
    tpu.vector_store %arg2[%c0_4, %c0_5], %23 {strides = array<i32>} : memref<4x128xf32, #tpu.memory_space<vmem>>, vector<4x128xf32>,
    return
  }
  func.func @transform_0(%arg0: i32) -> (i32, i32) {
    %c0_i32 = arith.constant 0 : i32
    %c0_i32_0 = arith.constant 0 : i32
    return %arg0, %c0_i32 : i32, i32
  }
  func.func @transform_1(%arg0: i32) -> (i32, i32) {
    %c0_i32 = arith.constant 0 : i32
    %c0_i32_0 = arith.constant 0 : i32
    return %arg0, %c0_i32 : i32, i32
  }
}

</mosaic_0001>

<bundles_post_ra>
// kernel: tpu_custom_call.1
= control target key start
LH: loop header
LB: loop body
LE: loop exit
PB: predicated region body
PF: predicated region fallthrough
CT: control target
= control target key end

     0   :  { %6 = vsyncpa [#allocation3], 0  ;;  %s145_s0 = inlined_call_operand.hbm [shape: f32[4,128], index: 0, kind: input, shape index: {}]   ;;  %s146_s1 = inlined_call_operand.hbm [shape: f32[4,128], index: 1, kind: output, shape index: {}]  }
   0x1   :  { %7 = vsyncpa [#allocation4], 0  ;;  %s108_s6 = smov [#allocation2]   ;;  %s60_s10 = scalar_lea.hbm %s145_s0, 64 }
   0x2   :  { %s14_s7 = sshll.u32 %s108_s6, 4  ;;  %p61_p0 = scmp.ne.s32.totalorder %s145_s0, %s60_s10  ;;  %s15_s7 = int_to_ptr.vmem [resolvable:$true] %s14_s7 }
   0x3   :  { %p64_p1 = scmp.lt.u32.totalorder %s60_s10, %s145_s0 }
   0x5   :  { %p66_p2 = pnand %p64_p1, %p61_p0 }
   0x7   :  { %69 = shalt.err (!%p66_p2)
}
   0x8   :  { %s70_s15 = scalar_lea.vmem %s15_s7, 64  ;;  %p75_p4 = scmp.lt.s32.totalorder %s15_s7, %s15_s7 }
   0x9   :  { %p71_p3 = scmp.ne.s32.totalorder %s15_s7, %s70_s15  ;;  %p76_p5 = scmp.lt.s32.totalorder %s70_s15, %s70_s15 }
   0xb   :  { %p77_p6 = por %p76_p5, %p75_p4 }
   0xd   :  { %p78_p7 = pnand %p77_p6, %p71_p3 }
   0xf   :  { %81 = shalt.err (!%p78_p7)
}
  0x10   :  { %17 = dma.hbm_to_vmem [thread:$0]  %s145_s0, 64, %s15_s7, [#allocation3]  }
  0x11   :  { %104 = dma.done.wait [#allocation3], 64  }
  0x12   :  { %105 = vsyncadd [#allocation3], 4294967232  ;;  %v21_v0 = vld [vmem:[#allocation2] sm:$0xf]  ;;  %s109_s18 = smov 125   ;;  %v24_v1 = vlaneseq  ;;  %s110_s19 = smov [#allocation5]  }
  0x13   :  { %22 = vrot.lane.b32.xlu0 %v21_v0, %s109_s18  ;;  %s48_s20 = sshll.u32 %s110_s19, 4  ;;  %s49_s20 = int_to_ptr.vmem [resolvable:$true] %s48_s20 }
  0x14   :  { %v25_v2 = vand.u32 127, %v24_v1  ;;  %s82_s21 = scalar_lea.vmem %s49_s20, 64  ;;  %p87_p9 = scmp.lt.s32.totalorder %s49_s20, %s49_s20 }
  0x15   :  { %p83_p8 = scmp.ne.s32.totalorder %s49_s20, %s82_s21  ;;  %p88_p10 = scmp.lt.s32.totalorder %s82_s21, %s82_s21 }
  0x16   :  { %v30_v3 = vand.u32 15, %v25_v2 }
  0x17   :  { %p89_p11 = por %p88_p10, %p87_p9 }
  0x18   :  { %vm38_vm0 = vcmp.lt.s32.totalorder %v30_v3, 13 }
  0x19   :  { %p90_p12 = pnand %p89_p11, %p83_p8 }
  0x85   :  { %v23_v4 = vpop.permute.xlu0 %22 }
  0x86   :  { %v39_v5 = vsel %vm38_vm0, %v23_v4, 0.0 }
  0x87   :  { %v40_v6 = vsub.f32 %v21_v0, %v39_v5 }
  0x89   :  { %41 = vst [vmem:[#allocation5] sm:$0xf] %v40_v6 }
  0x8a   :  { %93 = shalt.err (!%p90_p12)
}
  0x8b   :  { %s94_s23 = scalar_lea.hbm %s146_s1, 64 }
  0x8c   :  { %p95_p13 = scmp.ne.s32.totalorder %s146_s1, %s94_s23  ;;  %p98_p0 = scmp.lt.u32.totalorder %s94_s23, %s146_s1 }
  0x8e   :  { %p100_p1 = pnand %p98_p0, %p95_p13 }
  0x90   :  { %103 = shalt.err (!%p100_p1)
}
  0x91   :  { %51 = dma.vmem_to_hbm [thread:$0]  %s49_s20, 64, %s146_s1, [#allocation4]  }
  0x92   :  { %106 = dma.done.wait [#allocation4], 64  }
  0x93   :  { %107 = vsyncadd [#allocation4], 4294967232 }
  0x94   :  { %55 = vsyncpa [#allocation3], 1 }
  0x95   :  { %56 = vsyncpa [#allocation4], 1 }

</bundles_post_ra>
